<compile_context>
chip_gen: v7x
topology: tpu7x:2x2x1
jax: 0.10.0
libtpu: 0.0.40
codegen_flags: <defaults>
</compile_context>

<pallas_src>
import functools

import jax
import jax.numpy as jnp
from jax import lax
from jax.experimental import pallas as pl
from jax.experimental.pallas import tpu as pltpu


def _msa_kernel(x_ref, t1_ref, t3_ref, o_ref, *, H, W, L):
    """Fused MultiScaleAttention forward for one lane block (B_tile images).

    x_ref : (3H, L)      input slab, rows = c*H + h, cols = b*W + w   (f32)
    t1_ref: (6H, 27H)    fused Toeplitz weights for the 5x5 + 9x9 convs
    t3_ref: (H, 18H)     fused Toeplitz weights for the 3x3 aggConv
    o_ref : (H, L)       sigmoid attention map                         (f32)
    """
    mm_dtype = t1_ref.dtype
    x = x_ref[...]                                           # (3H, L) f32

    # Per-column position within its own image (static shapes -> cheap VPU ops).
    w_local = lax.broadcasted_iota(jnp.int32, (1, L), 1) % W

    def shifted(v, s):
        """v shifted by s columns *within each W-wide image*, zero at the edges.

        Uses an XLU lane rotate + mask; the global roll never mixes images at
        in-range positions, and out-of-range positions are masked to zero.
        """
        if s == 0:
            return v
        rolled = pltpu.roll(v, (-s) % L, axis=1)             # rolled[i] = v[i + s]
        ok = (w_local >= -s) & (w_local < W - s)              # 0 <= w + s < W
        return jnp.where(ok, rolled, jnp.zeros_like(rolled))

    # ---- scaleConv1 (5x5) + scaleConv2 (9x9): one MXU matmul, K = 27H ----
    stack1 = jnp.concatenate([shifted(x, kw - 4) for kw in range(9)], axis=0)
    feat = jnp.dot(t1_ref[...], stack1.astype(mm_dtype),
                   preferred_element_type=jnp.float32)        # (6H, L) f32

    xa, xb, xc = x[0:H], x[H:2 * H], x[2 * H:3 * H]
    f1a, f1b, f1c = feat[0:H], feat[H:2 * H], feat[2 * H:3 * H]
    f2a, f2b, f2c = feat[3 * H:4 * H], feat[4 * H:5 * H], feat[5 * H:6 * H]
    third = jnp.float32(1.0 / 3.0)

    # 6-channel feature map (channel order == torch.cat order), kept in f32/VPU.
    f6 = jnp.concatenate([
        jnp.maximum(jnp.maximum(xa, xb), xc),
        (xa + xb + xc) * third,
        jnp.maximum(jnp.maximum(f1a, f1b), f1c),
        (f1a + f1b + f1c) * third,
        jnp.maximum(jnp.maximum(f2a, f2b), f2c),
        (f2a + f2b + f2c) * third,
    ], axis=0)                                                # (6H, L)

    # ---- aggConv (3x3, 6->1): one MXU matmul (K = 18H), then sigmoid (EUP) ----
    stack3 = jnp.concatenate([shifted(f6, kw - 1) for kw in range(3)], axis=0)
    agg = jnp.dot(t3_ref[...], stack3.astype(mm_dtype),
                  preferred_element_type=jnp.float32)         # (H, L)
    o_ref[...] = jax.nn.sigmoid(agg)


def _build_toeplitz_weights(w1, w2, w3, H):
    """Fold the channel + vertical (kh) contraction of each conv into banded
    Toeplitz matrices (zero-padding in h folded in as zero weights), laid out
    with the kw taps fused into the contraction axis:
        T1f[co*H + h, kw*3H + ci*H + hr] = Wc[co, ci, hr - h + 4, kw]
        T3f[h,       kw*6H + cf*H + hr] = w3[0, cf, hr - h + 1, kw]
    """
    # Combined 6x3x9x9 weight bank: 5x5 weights embedded in the 9x9 support.
    Wc = jnp.zeros((6, 3, 9, 9), jnp.float32)
    Wc = Wc.at[0:3, :, 2:7, 2:7].set(w1)
    Wc = Wc.at[3:6].set(w2)

    h_idx = jnp.arange(H)
    d = h_idx[None, :] + 4 - h_idx[:, None]                   # d[h, hr] = hr + 4 - h
    valid = (d >= 0) & (d <= 8)
    Wg = jnp.transpose(Wc, (0, 1, 3, 2))                      # (co, ci, kw, kh)
    T1 = Wg[:, :, :, jnp.clip(d, 0, 8)]                       # (co, ci, kw, h, hr)
    T1 = jnp.where(valid[None, None, None], T1, 0.0)
    T1f = jnp.transpose(T1, (0, 3, 2, 1, 4)).reshape(6 * H, 27 * H)

    d3 = h_idx[None, :] + 1 - h_idx[:, None]                  # d3[h, hr] = hr + 1 - h
    valid3 = (d3 >= 0) & (d3 <= 2)
    W3g = jnp.transpose(w3[0], (0, 2, 1))                     # (cf, kw, kh)
    T3 = W3g[:, :, jnp.clip(d3, 0, 2)]                        # (cf, kw, h, hr)
    T3 = jnp.where(valid3[None, None], T3, 0.0)
    T3f = jnp.transpose(T3, (2, 1, 0, 3)).reshape(H, 18 * H)
    return T1f, T3f


def make_multi_scale_attention(w1, w2, w3, height, width,
                               compute_dtype=jnp.float32):
    """Fold weights once and return a jitted forward fn: (N,3,H,W) -> (N,1,H,W).

    compute_dtype: matmul operand dtype (f32 default; jnp.bfloat16 on v6e/v7x for
    2x MXU rate + half the weight VMEM, accumulation stays f32).
    """
    H, W = int(height), int(width)
    assert H % 8 == 0, "H must be a multiple of 8 (TPU sublane tiling)"
    assert (W % 128 == 0) or (128 % W == 0), (
        "W must divide 128 or be a multiple of 128")  # TODO(synk): general W tiling

    T1f, T3f = _build_toeplitz_weights(
        jnp.asarray(w1, jnp.float32), jnp.asarray(w2, jnp.float32),
        jnp.asarray(w3, jnp.float32), H)
    T1f = T1f.astype(compute_dtype)
    T3f = T3f.astype(compute_dtype)

    B_tile = 1 if W % 128 == 0 else 128 // W                  # images per lane block
    L_blk = B_tile * W                                        # lanes per grid step

    @jax.jit
    def forward(x):
        N = x.shape[0]
        assert x.shape == (N, 3, H, W), f"expected (N,3,{H},{W}), got {x.shape}"
        x = x.astype(jnp.float32)
        # Pad the batch to a whole number of lane blocks (padded images are
        # never mixed into real ones: the shift mask is per-W-block).
        Np = ((N + B_tile - 1) // B_tile) * B_tile
        if Np != N:
            x = jnp.pad(x, ((0, Np - N), (0, 0), (0, 0), (0, 0)))
        # Lane-dense layout: (N,3,H,W) -> (3H, Np*W); rows = c*H+h, cols = n*W+w.
        x2 = jnp.transpose(x, (1, 2, 0, 3)).reshape(3 * H, Np * W)

        out2 = pl.pallas_call(
            functools.partial(_msa_kernel, H=H, W=W, L=L_blk),
            out_shape=jax.ShapeDtypeStruct((H, Np * W), jnp.float32),
            grid=(Np // B_tile,),
            in_specs=[
                pl.BlockSpec((3 * H, L_blk), lambda i: (0, i)),
                # Constant block index over the grid -> weights DMA'd once.
                pl.BlockSpec((6 * H, 27 * H), lambda i: (0, 0)),
                pl.BlockSpec((H, 18 * H), lambda i: (0, 0)),
            ],
            out_specs=pl.BlockSpec((H, L_blk), lambda i: (0, i)),
            compiler_params=pltpu.CompilerParams(
                dimension_semantics=("parallel",)),
        )(x2, T1f, T3f)

        out = out2.reshape(H, Np, W).transpose(1, 0, 2)[:N]   # (N, H, W)
        return out[:, None]                                   # (N, 1, H, W)

    return forward


def _reference(x, w1, w2, w3):
    """Pure-JAX reference mirroring the PyTorch forward exactly (bias=False)."""
    def conv(v, w, p):
        return lax.conv_general_dilated(
            v, w, window_strides=(1, 1), padding=[(p, p), (p, p)],
            dimension_numbers=("NCHW", "OIHW", "NCHW"))

    out_max = jnp.max(x, axis=1, keepdims=True)
    out_avg = jnp.mean(x, axis=1, keepdims=True)
    o1 = conv(x, w1, 2)
    o2 = conv(x, w2, 4)
    cat = jnp.concatenate(
        [out_max, out_avg,
         jnp.max(o1, axis=1, keepdims=True), jnp.mean(o1, axis=1, keepdims=True),
         jnp.max(o2, axis=1, keepdims=True), jnp.mean(o2, axis=1, keepdims=True)],
        axis=1)
    return jax.nn.sigmoid(conv(cat, w3, 1))


if __name__ == "__main__":
    key = jax.random.PRNGKey(0)
    kx, k1, k2, k3 = jax.random.split(key, 4)

    H = W = 16
    # Deterministic synthetic parameters (shapes per nn.Conv2d in __init__, bias=False).
    w1 = 0.1 * jax.random.normal(k1, (3, 3, 5, 5), dtype=jnp.float32)
    w2 = 0.1 * jax.random.normal(k2, (3, 3, 9, 9), dtype=jnp.float32)
    w3 = 0.1 * jax.random.normal(k3, (1, 6, 3, 3), dtype=jnp.float32)

    msa = make_multi_scale_attention(w1, w2, w3, H, W)

    # N=8 fills a full 128-lane block (8 images x W=16); N=2 exercises batch padding.
    for N in (8, 2):
        x = jax.random.normal(jax.random.fold_in(kx, N), (N, 3, H, W),
                              dtype=jnp.float32)
        out = jax.block_until_ready(msa(x))
        ref = jax.block_until_ready(_reference(x, w1, w2, w3))
        assert out.shape == (N, 1, H, W)
        assert jnp.allclose(out, ref, atol=2e-3, rtol=2e-3), \
            f"mismatch vs reference (N={N})"

    print("KERNEL_OK")
</pallas_src>

<mosaic_0001>
module attributes {stable_mosaic.version = 11 : i64} {
  func.func @_msa_kernel(%arg0: i32, %arg1: memref<48x128xf32, #tpu.memory_space<vmem>>, %arg2: memref<96x432xf32, #tpu.memory_space<vmem>>, %arg3: memref<16x288xf32, #tpu.memory_space<vmem>>, %arg4: memref<16x128xf32, #tpu.memory_space<vmem>>) attributes {dimension_semantics = [#tpu.dimension_semantics<parallel>], iteration_bounds = array<i64: 1>, scalar_prefetch = 0 : i64, scratch_operands = 0 : i64, tpu.core_type = #tpu.core_type<tc>, window_params = [{transform_indices = @transform_0, window_bounds = array<i64: 48, 128>}, {pipeline_mode = #tpu.pipeline_mode<synchronous>, transform_indices = @transform_1, window_bounds = array<i64: 96, 432>}, {pipeline_mode = #tpu.pipeline_mode<synchronous>, transform_indices = @transform_2, window_bounds = array<i64: 16, 288>}, {transform_indices = @transform_3, window_bounds = array<i64: 16, 128>}]} {
    %c0 = arith.constant 0 : index
    %c0_0 = arith.constant 0 : index
    %0 = vector.load %arg1[%c0, %c0_0] : memref<48x128xf32, #tpu.memory_space<vmem>>, vector<48x128xf32>
    %1 = tpu.iota {dimensions = array<i32: 1>} : vector<1x128xi32>
    %c16_i32 = arith.constant 16 : i32
    %c0_i32 = arith.constant 0 : i32
    %2 = arith.cmpi eq, %c16_i32, %c0_i32 : i32
    %c1_i32 = arith.constant 1 : i32
    %3 = arith.select %2, %c1_i32, %c16_i32 : i32
    %4 = vector.broadcast %3 : i32 to vector<1x128xi32>
    %5 = arith.remsi %1, %4 : vector<1x128xi32>
    %c0_i32_1 = arith.constant 0 : i32
    %6 = vector.broadcast %c0_i32_1 : i32 to vector<1x128xi32>
    %7 = arith.cmpi ne, %5, %6 : vector<1x128xi32>
    %c0_i32_2 = arith.constant 0 : i32
    %8 = vector.broadcast %c0_i32_2 : i32 to vector<1x128xi32>
    %9 = arith.cmpi slt, %5, %8 : vector<1x128xi32>
    %c0_i32_3 = arith.constant 0 : i32
    %10 = arith.cmpi slt, %3, %c0_i32_3 : i32
    %11 = vector.broadcast %10 : i1 to vector<1x128xi1>
    %12 = vector.broadcast %11 : vector<1x128xi1> to vector<1x128xi1>
    %13 = arith.xori %9, %12 : vector<1x128xi1>
    %14 = arith.andi %13, %7 : vector<1x128xi1>
    %15 = vector.broadcast %3 : i32 to vector<1x128xi32>
    %16 = arith.addi %5, %15 : vector<1x128xi32>
    %17 = arith.select %14, %16, %5 : vector<1x128xi1>, vector<1x128xi32>
    %c4_i32 = arith.constant 4 : i32
    %18 = tpu.dynamic_rotate %0 by %c4_i32 dim 1 : vector<48x128xf32>, i32 -> vector<48x128xf32>
    %c4_i32_4 = arith.constant 4 : i32
    %19 = vector.broadcast %c4_i32_4 : i32 to vector<1x128xi32>
    %20 = arith.cmpi sge, %17, %19 : vector<1x128xi32>
    %c20_i32 = arith.constant 20 : i32
    %21 = vector.broadcast %c20_i32 : i32 to vector<1x128xi32>
    %22 = arith.cmpi slt, %17, %21 : vector<1x128xi32>
    %23 = arith.andi %20, %22 : vector<1x128xi1>
    %cst = arith.constant 0.000000e+00 : f32
    %24 = vector.broadcast %cst : f32 to vector<48x128xf32>
    %25 = vector.shape_cast %23 : vector<1x128xi1> to vector<1x128xi1>
    %26 = vector.broadcast %25 : vector<1x128xi1> to vector<48x128xi1>
    %27 = arith.select %26, %18, %24 : vector<48x128xi1>, vector<48x128xf32>
    %c3_i32 = arith.constant 3 : i32
    %28 = tpu.dynamic_rotate %0 by %c3_i32 dim 1 : vector<48x128xf32>, i32 -> vector<48x128xf32>
    %c3_i32_5 = arith.constant 3 : i32
    %29 = vector.broadcast %c3_i32_5 : i32 to vector<1x128xi32>
    %30 = arith.cmpi sge, %17, %29 : vector<1x128xi32>
    %c19_i32 = arith.constant 19 : i32
    %31 = vector.broadcast %c19_i32 : i32 to vector<1x128xi32>
    %32 = arith.cmpi slt, %17, %31 : vector<1x128xi32>
    %33 = arith.andi %30, %32 : vector<1x128xi1>
    %cst_6 = arith.constant 0.000000e+00 : f32
    %34 = vector.broadcast %cst_6 : f32 to vector<48x128xf32>
    %35 = vector.shape_cast %33 : vector<1x128xi1> to vector<1x128xi1>
    %36 = vector.broadcast %35 : vector<1x128xi1> to vector<48x128xi1>
    %37 = arith.select %36, %28, %34 : vector<48x128xi1>, vector<48x128xf32>
    %c2_i32 = arith.constant 2 : i32
    %38 = tpu.dynamic_rotate %0 by %c2_i32 dim 1 : vector<48x128xf32>, i32 -> vector<48x128xf32>
    %c2_i32_7 = arith.constant 2 : i32
    %39 = vector.broadcast %c2_i32_7 : i32 to vector<1x128xi32>
    %40 = arith.cmpi sge, %17, %39 : vector<1x128xi32>
    %c18_i32 = arith.constant 18 : i32
    %41 = vector.broadcast %c18_i32 : i32 to vector<1x128xi32>
    %42 = arith.cmpi slt, %17, %41 : vector<1x128xi32>
    %43 = arith.andi %40, %42 : vector<1x128xi1>
    %cst_8 = arith.constant 0.000000e+00 : f32
    %44 = vector.broadcast %cst_8 : f32 to vector<48x128xf32>
    %45 = vector.shape_cast %43 : vector<1x128xi1> to vector<1x128xi1>
    %46 = vector.broadcast %45 : vector<1x128xi1> to vector<48x128xi1>
    %47 = arith.select %46, %38, %44 : vector<48x128xi1>, vector<48x128xf32>
    %c1_i32_9 = arith.constant 1 : i32
    %48 = tpu.dynamic_rotate %0 by %c1_i32_9 dim 1 : vector<48x128xf32>, i32 -> vector<48x128xf32>
    %c1_i32_10 = arith.constant 1 : i32
    %49 = vector.broadcast %c1_i32_10 : i32 to vector<1x128xi32>
    %50 = arith.cmpi sge, %17, %49 : vector<1x128xi32>
    %c17_i32 = arith.constant 17 : i32
    %51 = vector.broadcast %c17_i32 : i32 to vector<1x128xi32>
    %52 = arith.cmpi slt, %17, %51 : vector<1x128xi32>
    %53 = arith.andi %50, %52 : vector<1x128xi1>
    %cst_11 = arith.constant 0.000000e+00 : f32
    %54 = vector.broadcast %cst_11 : f32 to vector<48x128xf32>
    %55 = vector.shape_cast %53 : vector<1x128xi1> to vector<1x128xi1>
    %56 = vector.broadcast %55 : vector<1x128xi1> to vector<48x128xi1>
    %57 = arith.select %56, %48, %54 : vector<48x128xi1>, vector<48x128xf32>
    %c127_i32 = arith.constant 127 : i32
    %58 = tpu.dynamic_rotate %0 by %c127_i32 dim 1 : vector<48x128xf32>, i32 -> vector<48x128xf32>
    %c-1_i32 = arith.constant -1 : i32
    %59 = vector.broadcast %c-1_i32 : i32 to vector<1x128xi32>
    %60 = arith.cmpi sge, %17, %59 : vector<1x128xi32>
    %c15_i32 = arith.constant 15 : i32
    %61 = vector.broadcast %c15_i32 : i32 to vector<1x128xi32>
    %62 = arith.cmpi slt, %17, %61 : vector<1x128xi32>
    %63 = arith.andi %60, %62 : vector<1x128xi1>
    %cst_12 = arith.constant 0.000000e+00 : f32
    %64 = vector.broadcast %cst_12 : f32 to vector<48x128xf32>
    %65 = vector.shape_cast %63 : vector<1x128xi1> to vector<1x128xi1>
    %66 = vector.broadcast %65 : vector<1x128xi1> to vector<48x128xi1>
    %67 = arith.select %66, %58, %64 : vector<48x128xi1>, vector<48x128xf32>
    %c126_i32 = arith.constant 126 : i32
    %68 = tpu.dynamic_rotate %0 by %c126_i32 dim 1 : vector<48x128xf32>, i32 -> vector<48x128xf32>
    %c-2_i32 = arith.constant -2 : i32
    %69 = vector.broadcast %c-2_i32 : i32 to vector<1x128xi32>
    %70 = arith.cmpi sge, %17, %69 : vector<1x128xi32>
    %c14_i32 = arith.constant 14 : i32
    %71 = vector.broadcast %c14_i32 : i32 to vector<1x128xi32>
    %72 = arith.cmpi slt, %17, %71 : vector<1x128xi32>
    %73 = arith.andi %70, %72 : vector<1x128xi1>
    %cst_13 = arith.constant 0.000000e+00 : f32
    %74 = vector.broadcast %cst_13 : f32 to vector<48x128xf32>
    %75 = vector.shape_cast %73 : vector<1x128xi1> to vector<1x128xi1>
    %76 = vector.broadcast %75 : vector<1x128xi1> to vector<48x128xi1>
    %77 = arith.select %76, %68, %74 : vector<48x128xi1>, vector<48x128xf32>
    %c125_i32 = arith.constant 125 : i32
    %78 = tpu.dynamic_rotate %0 by %c125_i32 dim 1 : vector<48x128xf32>, i32 -> vector<48x128xf32>
    %c-3_i32 = arith.constant -3 : i32
    %79 = vector.broadcast %c-3_i32 : i32 to vector<1x128xi32>
    %80 = arith.cmpi sge, %17, %79 : vector<1x128xi32>
    %c13_i32 = arith.constant 13 : i32
    %81 = vector.broadcast %c13_i32 : i32 to vector<1x128xi32>
    %82 = arith.cmpi slt, %17, %81 : vector<1x128xi32>
    %83 = arith.andi %80, %82 : vector<1x128xi1>
    %cst_14 = arith.constant 0.000000e+00 : f32
    %84 = vector.broadcast %cst_14 : f32 to vector<48x128xf32>
    %85 = vector.shape_cast %83 : vector<1x128xi1> to vector<1x128xi1>
    %86 = vector.broadcast %85 : vector<1x128xi1> to vector<48x128xi1>
    %87 = arith.select %86, %78, %84 : vector<48x128xi1>, vector<48x128xf32>
    %c124_i32 = arith.constant 124 : i32
    %88 = tpu.dynamic_rotate %0 by %c124_i32 dim 1 : vector<48x128xf32>, i32 -> vector<48x128xf32>
    %c-4_i32 = arith.constant -4 : i32
    %89 = vector.broadcast %c-4_i32 : i32 to vector<1x128xi32>
    %90 = arith.cmpi sge, %17, %89 : vector<1x128xi32>
    %c12_i32 = arith.constant 12 : i32
    %91 = vector.broadcast %c12_i32 : i32 to vector<1x128xi32>
    %92 = arith.cmpi slt, %17, %91 : vector<1x128xi32>
    %93 = arith.andi %90, %92 : vector<1x128xi1>
    %cst_15 = arith.constant 0.000000e+00 : f32
    %94 = vector.broadcast %cst_15 : f32 to vector<48x128xf32>
    %95 = vector.shape_cast %93 : vector<1x128xi1> to vector<1x128xi1>
    %96 = vector.broadcast %95 : vector<1x128xi1> to vector<48x128xi1>
    %97 = arith.select %96, %88, %94 : vector<48x128xi1>, vector<48x128xf32>
    %98 = tpu.concatenate %27, %37, %47, %57, %0, %67, %77, %87, %97 in 0 : vector<48x128xf32>, vector<48x128xf32>, vector<48x128xf32>, vector<48x128xf32>, vector<48x128xf32>, vector<48x128xf32>, vector<48x128xf32>, vector<48x128xf32>, vector<48x128xf32> -> vector<432x128xf32>
    %c0_16 = arith.constant 0 : index
    %c0_17 = arith.constant 0 : index
    %99 = vector.load %arg2[%c0_16, %c0_17] : memref<96x432xf32, #tpu.memory_space<vmem>>, vector<96x432xf32>
    %cst_18 = arith.constant dense<0.000000e+00> : vector<96x128xf32>
    %100 = tpu.matmul %99, %98, %cst_18 {dimension_numbers = #tpu.dot_dimension_numbers<[1], [0], [0], [1], [0, 0, 1, 1], [], []>} : vector<96x432xf32>, vector<432x128xf32>, vector<96x128xf32> -> vector<96x128xf32>
    %101 = vector.extract_strided_slice %0 {offsets = [0, 0], sizes = [16, 128], strides = [1, 1]} : vector<48x128xf32> to vector<16x128xf32>
    %102 = vector.extract_strided_slice %0 {offsets = [16, 0], sizes = [16, 128], strides = [1, 1]} : vector<48x128xf32> to vector<16x128xf32>
    %103 = vector.extract_strided_slice %0 {offsets = [32, 0], sizes = [16, 128], strides = [1, 1]} : vector<48x128xf32> to vector<16x128xf32>
    %104 = vector.extract_strided_slice %100 {offsets = [0, 0], sizes = [16, 128], strides = [1, 1]} : vector<96x128xf32> to vector<16x128xf32>
    %105 = vector.extract_strided_slice %100 {offsets = [16, 0], sizes = [16, 128], strides = [1, 1]} : vector<96x128xf32> to vector<16x128xf32>
    %106 = vector.extract_strided_slice %100 {offsets = [32, 0], sizes = [16, 128], strides = [1, 1]} : vector<96x128xf32> to vector<16x128xf32>
    %107 = vector.extract_strided_slice %100 {offsets = [48, 0], sizes = [16, 128], strides = [1, 1]} : vector<96x128xf32> to vector<16x128xf32>
    %108 = vector.extract_strided_slice %100 {offsets = [64, 0], sizes = [16, 128], strides = [1, 1]} : vector<96x128xf32> to vector<16x128xf32>
    %109 = vector.extract_strided_slice %100 {offsets = [80, 0], sizes = [16, 128], strides = [1, 1]} : vector<96x128xf32> to vector<16x128xf32>
    %110 = arith.maximumf %101, %102 : vector<16x128xf32>
    %111 = arith.maximumf %110, %103 : vector<16x128xf32>
    %112 = arith.addf %101, %102 : vector<16x128xf32>
    %113 = arith.addf %112, %103 : vector<16x128xf32>
    %cst_19 = arith.constant 0.333333343 : f32
    %114 = vector.broadcast %cst_19 : f32 to vector<16x128xf32>
    %115 = arith.mulf %113, %114 : vector<16x128xf32>
    %116 = arith.maximumf %104, %105 : vector<16x128xf32>
    %117 = arith.maximumf %116, %106 : vector<16x128xf32>
    %118 = arith.addf %104, %105 : vector<16x128xf32>
    %119 = arith.addf %118, %106 : vector<16x128xf32>
    %cst_20 = arith.constant 0.333333343 : f32
    %120 = vector.broadcast %cst_20 : f32 to vector<16x128xf32>
    %121 = arith.mulf %119, %120 : vector<16x128xf32>
    %122 = arith.maximumf %107, %108 : vector<16x128xf32>
    %123 = arith.maximumf %122, %109 : vector<16x128xf32>
    %124 = arith.addf %107, %108 : vector<16x128xf32>
    %125 = arith.addf %124, %109 : vector<16x128xf32>
    %cst_21 = arith.constant 0.333333343 : f32
    %126 = vector.broadcast %cst_21 : f32 to vector<16x128xf32>
    %127 = arith.mulf %125, %126 : vector<16x128xf32>
    %128 = tpu.concatenate %111, %115, %117, %121, %123, %127 in 0 : vector<16x128xf32>, vector<16x128xf32>, vector<16x128xf32>, vector<16x128xf32>, vector<16x128xf32>, vector<16x128xf32> -> vector<96x128xf32>
    %c1_i32_22 = arith.constant 1 : i32
    %129 = tpu.dynamic_rotate %128 by %c1_i32_22 dim 1 : vector<96x128xf32>, i32 -> vector<96x128xf32>
    %c1_i32_23 = arith.constant 1 : i32
    %130 = vector.broadcast %c1_i32_23 : i32 to vector<1x128xi32>
    %131 = arith.cmpi sge, %17, %130 : vector<1x128xi32>
    %c17_i32_24 = arith.constant 17 : i32
    %132 = vector.broadcast %c17_i32_24 : i32 to vector<1x128xi32>
    %133 = arith.cmpi slt, %17, %132 : vector<1x128xi32>
    %134 = arith.andi %131, %133 : vector<1x128xi1>
    %cst_25 = arith.constant 0.000000e+00 : f32
    %135 = vector.broadcast %cst_25 : f32 to vector<96x128xf32>
    %136 = vector.shape_cast %134 : vector<1x128xi1> to vector<1x128xi1>
    %137 = vector.broadcast %136 : vector<1x128xi1> to vector<96x128xi1>
    %138 = arith.select %137, %129, %135 : vector<96x128xi1>, vector<96x128xf32>
    %c127_i32_26 = arith.constant 127 : i32
    %139 = tpu.dynamic_rotate %128 by %c127_i32_26 dim 1 : vector<96x128xf32>, i32 -> vector<96x128xf32>
    %c-1_i32_27 = arith.constant -1 : i32
    %140 = vector.broadcast %c-1_i32_27 : i32 to vector<1x128xi32>
    %141 = arith.cmpi sge, %17, %140 : vector<1x128xi32>
    %c15_i32_28 = arith.constant 15 : i32
    %142 = vector.broadcast %c15_i32_28 : i32 to vector<1x128xi32>
    %143 = arith.cmpi slt, %17, %142 : vector<1x128xi32>
    %144 = arith.andi %141, %143 : vector<1x128xi1>
    %cst_29 = arith.constant 0.000000e+00 : f32
    %145 = vector.broadcast %cst_29 : f32 to vector<96x128xf32>
    %146 = vector.shape_cast %144 : vector<1x128xi1> to vector<1x128xi1>
    %147 = vector.broadcast %146 : vector<1x128xi1> to vector<96x128xi1>
    %148 = arith.select %147, %139, %145 : vector<96x128xi1>, vector<96x128xf32>
    %149 = tpu.concatenate %138, %128, %148 in 0 : vector<96x128xf32>, vector<96x128xf32>, vector<96x128xf32> -> vector<288x128xf32>
    %c0_30 = arith.constant 0 : index
    %c0_31 = arith.constant 0 : index
    %150 = vector.load %arg3[%c0_30, %c0_31] : memref<16x288xf32, #tpu.memory_space<vmem>>, vector<16x288xf32>
    %cst_32 = arith.constant dense<0.000000e+00> : vector<16x128xf32>
    %151 = tpu.matmul %150, %149, %cst_32 {dimension_numbers = #tpu.dot_dimension_numbers<[1], [0], [0], [1], [0, 0, 1, 1], [], []>} : vector<16x288xf32>, vector<288x128xf32>, vector<16x128xf32> -> vector<16x128xf32>
    %152 = arith.negf %151 : vector<16x128xf32>
    %153 = math.exp %152 : vector<16x128xf32>
    %cst_33 = arith.constant 1.000000e+00 : f32
    %154 = vector.broadcast %cst_33 : f32 to vector<16x128xf32>
    %155 = arith.addf %154, %153 : vector<16x128xf32>
    %156 = arith.divf %154, %155 : vector<16x128xf32>
    %c0_34 = arith.constant 0 : index
    %c0_35 = arith.constant 0 : index
    %157 = vector.load %arg4[%c0_34, %c0_35] : memref<16x128xf32, #tpu.memory_space<vmem>>, vector<16x128xf32>
    tpu.vector_store %arg4[%c0_34, %c0_35], %156 {strides = array<i32>} : memref<16x128xf32, #tpu.memory_space<vmem>>, vector<16x128xf32>,
    return
  }
  func.func @transform_0(%arg0: i32) -> (i32, i32) {
    %c0_i32 = arith.constant 0 : i32
    %c0_i32_0 = arith.constant 0 : i32
    return %c0_i32, %arg0 : i32, i32
  }
  func.func @transform_1(%arg0: i32) -> (i32, i32) {
    %c0_i32 = arith.constant 0 : i32
    %c0_i32_0 = arith.constant 0 : i32
    %c0_i32_1 = arith.constant 0 : i32
    return %c0_i32, %c0_i32_0 : i32, i32
  }
  func.func @transform_2(%arg0: i32) -> (i32, i32) {
    %c0_i32 = arith.constant 0 : i32
    %c0_i32_0 = arith.constant 0 : i32
    %c0_i32_1 = arith.constant 0 : i32
    return %c0_i32, %c0_i32_0 : i32, i32
  }
  func.func @transform_3(%arg0: i32) -> (i32, i32) {
    %c0_i32 = arith.constant 0 : i32
    %c0_i32_0 = arith.constant 0 : i32
    return %c0_i32, %arg0 : i32, i32
  }
}

</mosaic_0001>

<bundles_post_ra>
// kernel: forward.1
= control target key start
LH: loop header
LB: loop body
LE: loop exit
PB: predicated region body
PF: predicated region fallthrough
CT: control target
= control target key end

     0   :  { %v1387_v3 = vmov 0.0|0.0   ;;  %s1388_s24 = smov 127   ;;  %s1389_s25 = smov 2   ;;  %vm266_vm0 = vcmask 392192   ;;  %v20_v24 = vlaneseq  ;;  %s1824_s0 = inlined_call_operand.vmem [shape: f32[48,128], index: 0, kind: input, shape index: {}]   ;;  %s1825_s1 = inlined_call_operand.vmem [shape: f32[96,432], index: 1, kind: input, shape index: {}]   ;;  %s1826_s2 = inlined_call_operand.vmem [shape: f32[16,288], index: 2, kind: input, shape index: {}]   ;;  %s1827_s3 = inlined_call_operand.vmem [shape: f32[16,128], index: 3, kind: output, shape index: {}]  }
   0x1   :  { %v1419_v0 = vld [vmem:[%s1824_s0 + $0x10] sm:$0xff]  ;;  %v1424_v1 = vld [vmem:[%s1824_s0 + $0x18] sm:$0xff]  ;;  %v1429_v2 = vld [vmem:[%s1824_s0 + $0x20] sm:$0xff]  ;;  %1092 = vmatprep.subr.bf16.mxu1 %v1387_v3  ;;  %s1390_s26 = smov 126   ;;  %s1391_s27 = smov 4  }
   0x2   :  { %v1199_v4 = vpack.i.bf16 %v1424_v1, %v1419_v0  ;;  %v1437_v5 = vld [vmem:[%s1824_s0 + $0x28] sm:$0xff]  ;;  %v1442_v6 = vld [vmem:[%s1824_s0] sm:$0xff]  ;;  %s1393_s28 = smov 125   ;;  %s1394_s29 = smov 3   ;;  %v221_v11 = vld [vmem:[%s1825_s1 + $0x18] sm:$0xff]  ;;  %v21_v25 = vand.u32 127, %v20_v24 }
   0x3   :  { %v1447_v7 = vld [vmem:[%s1824_s0 + $0x8] sm:$0xff]  ;;  %v1209_v8 = vpack.i.bf16 %v1437_v5, %v1429_v2  ;;  %s1392_s0 = smov 1   ;;  %s1395_s30 = smov 124   ;;  %884 = vmatprep.mubr.msk.f32.mxu1 %vm266_vm0, %v221_v11  ;;  %v553_v12 = vmax.f32 %v1442_v6, %v1419_v0  ;;  %v557_v14 = vadd.f32 %v1419_v0, %v1442_v6  ;;  %v222_v35 = vld [vmem:[%s1825_s1 + $0x20] sm:$0xff] }
   0x4   :  { %1200 = vrot.lane.b32.xlu0 %v1199_v4, %s1388_s24  ;;  %v1214_v9 = vpack.i.bf16 %v1447_v7, %v1442_v6  ;;  %v219_v10 = vld [vmem:[%s1825_s1 + $0x8] sm:$0xff]  ;;  %v554_v13 = vmax.f32 %v1447_v7, %v1424_v1  ;;  %v558_v15 = vadd.f32 %v1424_v1, %v1447_v7  ;;  %v1501_v26 = vand.u32 15, %v21_v25 }
   0x5   :  { %1210 = vrot.lane.b32.xlu1 %v1209_v8, %s1389_s25  ;;  %367 = vmatprep.mubr.f32.mxu0 %v219_v10  ;;  %v1478_v16 = vmax.f32 %v553_v12, %v1429_v2  ;;  %v559_v18 = vadd.f32 %v557_v14, %v1429_v2 }
   0x6   :  { %v1481_v17 = vmax.f32 %v554_v13, %v1437_v5  ;;  %v560_v19 = vadd.f32 %v558_v15, %v1437_v5  ;;  %vm139_vm1 = vcmp.lt.s32.totalorder %v1501_v26, 15  ;;  %vm92_vm2 = vcmp.ge.s32.totalorder %v1501_v26, 2 }
   0x7   :  { %v1489_v21 = vmul.f32 0.33333334, %v559_v18  ;;  %vm1505_vm3 = vmpackc.low %vm139_vm1, %vm139_vm1  ;;  %vm46_vm5 = vcmp.ge.s32.totalorder %v1501_v26, 4  ;;  %vm162_vm6 = vcmp.lt.s32.totalorder %v1501_v26, 14  ;;  %vm115_vm7 = vcmp.ge.s32.totalorder %v1501_v26, 1 }
   0x8   :  { %1205 = vrot.lane.b32.xlu0 %v1209_v8, %s1388_s24  ;;  %v1487_v20 = vpack.i.bf16 %v1481_v17, %v1478_v16  ;;  %v1491_v22 = vmul.f32 0.33333334, %v560_v19  ;;  %vm1509_vm4 = vmpackc.low %vm92_vm2, %vm92_vm2  ;;  %vm185_vm11 = vcmp.lt.s32.totalorder %v1501_v26, 13  ;;  %vm69_vm12 = vcmp.ge.s32.totalorder %v1501_v26, 3 }
   0x9   :  { %1215 = vrot.lane.b32.xlu1 %v1214_v9, %s1390_s26  ;;  %vm1523_vm8 = vmpackc.low %vm46_vm5, %vm46_vm5  ;;  %vm208_vm15 = vcmp.lt.s32.totalorder %v1501_v26, 12  ;;  %v256_v26 = vld [vmem:[%s1825_s1 + $0x130] sm:$0xff] }
   0xa   :  { %v1497_v23 = vpack.i.bf16 %v1491_v22, %v1489_v21  ;;  %vm1528_vm9 = vmpackc.low %vm162_vm6, %vm162_vm6 }
   0xb   :  { %vm1532_vm10 = vmpackc.low %vm115_vm7, %vm115_vm7 }
   0xc   :  { %1220 = vrot.lane.b32.xlu0 %v1214_v9, %s1391_s27  ;;  %vm1559_vm13 = vmpackc.low %vm185_vm11, %vm185_vm11 }
   0xd   :  { %1225 = vrot.lane.b32.xlu1 %v1214_v9, %s1392_s0  ;;  %vm1563_vm14 = vmpackc.low %vm69_vm12, %vm69_vm12 }
   0xe   :  { %vm1589_vm1 = vmpackc.low %vm208_vm15, %vm208_vm15 }
  0x10   :  { %1230 = vrot.lane.b32.xlu0 %v1199_v4, %s1390_s26 }
  0x11   :  { %1235 = vrot.lane.b32.xlu1 %v1199_v4, %s1391_s27 }
  0x14   :  { %1240 = vrot.lane.b32.xlu0 %v1199_v4, %s1392_s0 }
  0x15   :  { %1245 = vrot.lane.b32.xlu1 %v1209_v8, %s1390_s26 }
  0x18   :  { %1250 = vrot.lane.b32.xlu0 %v1209_v8, %s1391_s27 }
  0x19   :  { %1255 = vrot.lane.b32.xlu1 %v1209_v8, %s1392_s0 }
  0x1c   :  { %1260 = vrot.lane.b32.xlu0 %v1214_v9, %s1393_s28 }
  0x1d   :  { %1265 = vrot.lane.b32.xlu1 %v1214_v9, %s1394_s29 }
  0x20   :  { %1270 = vrot.lane.b32.xlu0 %v1199_v4, %s1393_s28 }
  0x21   :  { %1275 = vrot.lane.b32.xlu1 %v1199_v4, %s1394_s29 }
  0x24   :  { %1280 = vrot.lane.b32.xlu0 %v1209_v8, %s1393_s28 }
  0x25   :  { %1285 = vrot.lane.b32.xlu1 %v1209_v8, %s1394_s29 }
  0x28   :  { %1290 = vrot.lane.b32.xlu0 %v1214_v9, %s1395_s30 }
  0x29   :  { %1295 = vrot.lane.b32.xlu1 %v1214_v9, %s1389_s25 }
  0x2c   :  { %1300 = vrot.lane.b32.xlu0 %v1214_v9, %s1388_s24 }
  0x2d   :  { %1305 = vrot.lane.b32.xlu1 %v1199_v4, %s1395_s30 }
  0x30   :  { %1310 = vrot.lane.b32.xlu0 %v1199_v4, %s1389_s25 }
  0x31   :  { %1315 = vrot.lane.b32.xlu1 %v1209_v8, %s1395_s30 }
  0x34   :  { %1320 = vrot.lane.b32.xlu0 %v1487_v20, %s1392_s0 }
  0x35   :  { %1325 = vrot.lane.b32.xlu1 %v1497_v23, %s1392_s0 }
  0x76   :  { %v1201_v27 = vpop.permute.xlu0 %1200 }
  0x77   :  { %v1203_v28 = vunpack.i.h.bf16 %v1201_v27  ;;  %v1202_v29 = vunpack.i.l.bf16 %v1201_v27  ;;  %v1211_v30 = vpop.permute.xlu1 %1210 }
  0x78   :  { %v1213_v31 = vunpack.i.h.bf16 %v1211_v30  ;;  %v1212_v32 = vunpack.i.l.bf16 %v1211_v30 }
  0x79   :  { %v1093_v34 = vpack.c.bf16 %v1203_v28, %v1202_v29 }
  0x7a   :  { %v1206_v36 = vpop.permute.xlu0 %1205  ;;  %v1047_v37 = vpack.c.bf16 %v1213_v31, %v1212_v32 }
  0x7b   :  { %v1208_v38 = vunpack.i.h.bf16 %v1206_v36  ;;  %v1207_v39 = vunpack.i.l.bf16 %v1206_v36  ;;  %1095 = vmatpush1.bf16.msk.msra.mxu1 %vm1505_vm3, %v1093_v34  ;;  %v1216_v40 = vpop.permute.xlu1 %1215 }
  0x7c   :  { %v1218_v41 = vunpack.i.h.bf16 %v1216_v40  ;;  %v1217_v42 = vunpack.i.l.bf16 %v1216_v40  ;;  %1049 = vmatprep.subr.msk.bf16.mxu0 %vm1509_vm4, %v1047_v37  ;;  %1096 = vmatprep.subr.bf16.mxu1 %v1387_v3  ;;  %v231_v40 = vld [vmem:[%s1825_s1 + $0x68] sm:$0xff] }
  0x7d   :  { %v1097_v43 = vpack.c.bf16 %v1208_v38, %v1207_v39  ;;  %v226_v38 = vld [vmem:[%s1825_s1 + $0x40] sm:$0xff] }
  0x7e   :  { %v1221_v44 = vpop.permute.xlu0 %1220  ;;  %v1101_v45 = vpack.c.bf16 %v1218_v41, %v1217_v42  ;;  %v1071_v41 = vpack.c.bf16 %v1447_v7, %v1442_v6  ;;  %v1076_v6 = vpack.c.bf16 %v1424_v1, %v1419_v0  ;;  %v1081_v0 = vpack.c.bf16 %v1437_v5, %v1429_v2 }
  0x7f   :  { %v1223_v46 = vunpack.i.h.bf16 %v1221_v44  ;;  %v1222_v47 = vunpack.i.l.bf16 %v1221_v44  ;;  %1099 = vmatpush1.bf16.msk.msra.mxu1 %vm1505_vm3, %v1097_v43  ;;  %v1226_v48 = vpop.permute.xlu1 %1225 }
  0x80   :  { %v1228_v50 = vunpack.i.h.bf16 %v1226_v48  ;;  %v1227_v51 = vunpack.i.l.bf16 %v1226_v48  ;;  %1100 = vmatprep.subr.bf16.mxu1 %v1387_v3 }
  0x81   :  { %v1050_v53 = vpack.c.bf16 %v1223_v46, %v1222_v47 }
  0x82   :  { %v1053_v55 = vpack.c.bf16 %v1228_v50, %v1227_v51  ;;  %v1231_v56 = vpop.permute.xlu0 %1230 }
  0x83   :  { %v1233_v57 = vunpack.i.h.bf16 %v1231_v56  ;;  %v1232_v58 = vunpack.i.l.bf16 %v1231_v56  ;;  %1052 = vmatpush3.bf16.msk.msra.mxu0 %vm1523_vm8, %v1050_v53  ;;  %1103 = vmatpush1.bf16.msk.msra.mxu1 %vm1528_vm9, %v1101_v45  ;;  %v1236_v59 = vpop.permute.xlu1 %1235 }
  0x84   :  { %v1238_v60 = vunpack.i.h.bf16 %v1236_v59  ;;  %v1237_v61 = vunpack.i.l.bf16 %v1236_v59  ;;  %1055 = vmatprep.subr.msk.bf16.mxu0 %vm1532_vm10, %v1053_v55  ;;  %1104 = vmatprep.subr.bf16.mxu1 %v1387_v3 }
  0x85   :  { %v1105_v62 = vpack.c.bf16 %v1233_v57, %v1232_v58 }
  0x86   :  { %v1056_v63 = vpack.c.bf16 %v1238_v60, %v1237_v61  ;;  %v1241_v4 = vpop.permute.xlu0 %1240 }
  0x87   :  { %v1243_v8 = vunpack.i.h.bf16 %v1241_v4  ;;  %v1242_v9 = vunpack.i.l.bf16 %v1241_v4  ;;  %1107 = vmatpush1.bf16.msk.msra.mxu1 %vm1528_vm9, %v1105_v62  ;;  %v1246_v10 = vpop.permute.xlu1 %1245 }
  0x88   :  { %v1248_v11 = vunpack.i.h.bf16 %v1246_v10  ;;  %v1247_v12 = vunpack.i.l.bf16 %v1246_v10  ;;  %1058 = vmatpush3.bf16.msk.msra.mxu0 %vm1523_vm8, %v1056_v63  ;;  %1108 = vmatprep.subr.bf16.mxu1 %v1387_v3 }
  0x89   :  { %v1059_v13 = vpack.c.bf16 %v1243_v8, %v1242_v9 }
  0x8a   :  { %v1109_v14 = vpack.c.bf16 %v1248_v11, %v1247_v12  ;;  %v1251_v15 = vpop.permute.xlu0 %1250 }
  0x8b   :  { %v1253_v18 = vunpack.i.h.bf16 %v1251_v15  ;;  %v1252_v19 = vunpack.i.l.bf16 %v1251_v15  ;;  %1061 = vmatprep.subr.msk.bf16.mxu0 %vm1532_vm10, %v1059_v13  ;;  %v1256_v24 = vpop.permute.xlu1 %1255 }
  0x8c   :  { %v1258_v25 = vunpack.i.h.bf16 %v1256_v24  ;;  %v1257_v27 = vunpack.i.l.bf16 %v1256_v24  ;;  %1111 = vmatpush1.bf16.msk.msra.mxu1 %vm1528_vm9, %v1109_v14 }
  0x8d   :  { %v1062_v28 = vpack.c.bf16 %v1253_v18, %v1252_v19  ;;  %1112 = vmatprep.subr.bf16.mxu1 %v1387_v3 }
  0x8e   :  { %v1065_v29 = vpack.c.bf16 %v1258_v25, %v1257_v27  ;;  %v1261_v30 = vpop.permute.xlu0 %1260 }
  0x8f   :  { %v1263_v31 = vunpack.i.h.bf16 %v1261_v30  ;;  %v1262_v32 = vunpack.i.l.bf16 %v1261_v30  ;;  %1064 = vmatpush3.bf16.msk.msra.mxu0 %vm1523_vm8, %v1062_v28  ;;  %v1266_v34 = vpop.permute.xlu1 %1265  ;;  %v218_v30 = vld [vmem:[%s1825_s1] sm:$0xff] }
  0x90   :  { %v1268_v36 = vunpack.i.h.bf16 %v1266_v34  ;;  %v1267_v37 = vunpack.i.l.bf16 %v1266_v34  ;;  %1067 = vmatprep.subr.msk.bf16.mxu0 %vm1532_vm10, %v1065_v29  ;;  %v224_v34 = vld [vmem:[%s1825_s1 + $0x30] sm:$0xff] }
  0x91   :  { %v1113_v39 = vpack.c.bf16 %v1263_v31, %v1262_v32  ;;  %v220_v31 = vld [vmem:[%s1825_s1 + $0x10] sm:$0xff]  ;;  %v223_v32 = vld [vmem:[%s1825_s1 + $0x28] sm:$0xff] }
  0x92   :  { %v1068_v42 = vpack.c.bf16 %v1268_v36, %v1267_v37  ;;  %v1271_v43 = vpop.permute.xlu0 %1270  ;;  %v227_v36 = vld [vmem:[%s1825_s1 + $0x48] sm:$0xff]  ;;  %v229_v37 = vld [vmem:[%s1825_s1 + $0x58] sm:$0xff] }
  0x93   :  { %v1273_v44 = vunpack.i.h.bf16 %v1271_v43  ;;  %v1272_v45 = vunpack.i.l.bf16 %v1271_v43  ;;  %1115 = vmatpush1.bf16.msk.msra.mxu1 %vm1559_vm13, %v1113_v39  ;;  %v1276_v46 = vpop.permute.xlu1 %1275  ;;  %v228_v39 = vld [vmem:[%s1825_s1 + $0x50] sm:$0xff] }
  0x94   :  { %v1278_v47 = vunpack.i.h.bf16 %v1276_v46  ;;  %v1277_v48 = vunpack.i.l.bf16 %v1276_v46  ;;  %1070 = vmatpush3.bf16.msk.msra.mxu0 %vm1563_vm14, %v1068_v42  ;;  %1116 = vmatprep.subr.bf16.mxu1 %v1387_v3  ;;  %v230_v42 = vld [vmem:[%s1825_s1 + $0x60] sm:$0xff]  ;;  %v232_v43 = vld [vmem:[%s1825_s1 + $0x70] sm:$0xff] }
  0x95   :  { %v1117_v49 = vpack.c.bf16 %v1273_v44, %v1272_v45  ;;  %1072 = vmatprep.subr.bf16.mxu0 %v1071_v41  ;;  %v233_v41 = vld [vmem:[%s1825_s1 + $0x78] sm:$0xff]  ;;  %v235_v44 = vld [vmem:[%s1825_s1 + $0x88] sm:$0xff]  ;;  %v234_v46 = vld [vmem:[%s1825_s1 + $0x80] sm:$0xff] }
  0x96   :  { %v1073_v7 = vpack.c.bf16 %v1278_v47, %v1277_v48  ;;  %v1281_v50 = vpop.permute.xlu0 %1280  ;;  %v237_v45 = vld [vmem:[%s1825_s1 + $0x98] sm:$0xff]  ;;  %v236_v47 = vld [vmem:[%s1825_s1 + $0x90] sm:$0xff]  ;;  %v239_v48 = vld [vmem:[%s1825_s1 + $0xa8] sm:$0xff] }
  0x97   :  { %v1283_v51 = vunpack.i.h.bf16 %v1281_v50  ;;  %v1282_v52 = vunpack.i.l.bf16 %v1281_v50  ;;  %1119 = vmatpush1.bf16.msk.msra.mxu1 %vm1559_vm13, %v1117_v49  ;;  %v1286_v53 = vpop.permute.xlu1 %1285  ;;  %v241_v49 = vld [vmem:[%s1825_s1 + $0xb8] sm:$0xff]  ;;  %v243_v50 = vld [vmem:[%s1825_s1 + $0xc8] sm:$0xff] }
  0x98   :  { %v1288_v55 = vunpack.i.h.bf16 %v1286_v53  ;;  %v1287_v56 = vunpack.i.l.bf16 %v1286_v53  ;;  %1075 = vmatpush3.bf16.msk.msra.mxu0 %vm1563_vm14, %v1073_v7  ;;  %1120 = vmatprep.subr.bf16.mxu1 %v1387_v3  ;;  %v240_v7 = vld [vmem:[%s1825_s1 + $0xb0] sm:$0xff] }
  0x99   :  { %v1121_v57 = vpack.c.bf16 %v1283_v51, %v1282_v52  ;;  %1077 = vmatprep.subr.bf16.mxu0 %v1076_v6  ;;  %v238_v6 = vld [vmem:[%s1825_s1 + $0xa0] sm:$0xff]  ;;  %v245_v51 = vld [vmem:[%s1825_s1 + $0xd8] sm:$0xff]  ;;  %v244_v53 = vld [vmem:[%s1825_s1 + $0xd0] sm:$0xff] }
  0x9a   :  { %v1078_v1 = vpack.c.bf16 %v1288_v55, %v1287_v56  ;;  %v1291_v58 = vpop.permute.xlu0 %1290  ;;  %v242_v52 = vld [vmem:[%s1825_s1 + $0xc0] sm:$0xff]  ;;  %v247_v55 = vld [vmem:[%s1825_s1 + $0xe8] sm:$0xff]  ;;  %v249_v56 = vld [vmem:[%s1825_s1 + $0xf8] sm:$0xff] }
  0x9b   :  { %v1293_v59 = vunpack.i.h.bf16 %v1291_v58  ;;  %v1292_v60 = vunpack.i.l.bf16 %v1291_v58  ;;  %1123 = vmatpush1.bf16.msk.msra.mxu1 %vm1559_vm13, %v1121_v57  ;;  %v1296_v61 = vpop.permute.xlu1 %1295  ;;  %v246_v57 = vld [vmem:[%s1825_s1 + $0xe0] sm:$0xff]  ;;  %v253_v58 = vld [vmem:[%s1825_s1 + $0x118] sm:$0xff] }
  0x9c   :  { %v1298_v62 = vunpack.i.h.bf16 %v1296_v61  ;;  %v1297_v63 = vunpack.i.l.bf16 %v1296_v61  ;;  %1080 = vmatpush3.bf16.msk.msra.mxu0 %vm1563_vm14, %v1078_v1  ;;  %1124 = vmatprep.subr.bf16.mxu1 %v1387_v3  ;;  %v251_v1 = vld [vmem:[%s1825_s1 + $0x108] sm:$0xff] }
  0x9d   :  { %v1125_v2 = vpack.c.bf16 %v1293_v59, %v1292_v60  ;;  %1082 = vmatprep.subr.bf16.mxu0 %v1081_v0  ;;  %v248_v0 = vld [vmem:[%s1825_s1 + $0xf0] sm:$0xff]  ;;  %v250_v59 = vld [vmem:[%s1825_s1 + $0x100] sm:$0xff]  ;;  %v255_v61 = vld [vmem:[%s1825_s1 + $0x128] sm:$0xff] }
  0x9e   :  { %v1083_v5 = vpack.c.bf16 %v1298_v62, %v1297_v63  ;;  %v1301_v4 = vpop.permute.xlu0 %1300  ;;  %v252_v60 = vld [vmem:[%s1825_s1 + $0x110] sm:$0xff]  ;;  %v257_v62 = vld [vmem:[%s1825_s1 + $0x138] sm:$0xff]  ;;  %v254_v63 = vld [vmem:[%s1825_s1 + $0x120] sm:$0xff] }
  0x9f   :  { %v1303_v8 = vunpack.i.h.bf16 %v1301_v4  ;;  %v1302_v9 = vunpack.i.l.bf16 %v1301_v4  ;;  %1127 = vmatpush1.bf16.msk.msra.mxu1 %vm1589_vm1, %v1125_v2  ;;  %v1306_v10 = vpop.permute.xlu1 %1305  ;;  %v259_v2 = vld [vmem:[%s1825_s1 + $0x148] sm:$0xff]  ;;  %v258_v4 = vld [vmem:[%s1825_s1 + $0x140] sm:$0xff] }
  0xa0   :  { %v1308_v11 = vunpack.i.h.bf16 %v1306_v10  ;;  %v1307_v12 = vunpack.i.l.bf16 %v1306_v10  ;;  %1085 = vmatpush3.bf16.msk.msra.mxu0 %vm1509_vm4, %v1083_v5  ;;  %1128 = vmatprep.subr.bf16.mxu1 %v1387_v3  ;;  %v261_v5 = vld [vmem:[%s1825_s1 + $0x158] sm:$0xff] }
  0xa1   :  { %v1086_v13 = vpack.c.bf16 %v1303_v8, %v1302_v9  ;;  %v260_v8 = vld [vmem:[%s1825_s1 + $0x150] sm:$0xff]  ;;  %v263_v9 = vld [vmem:[%s1825_s1 + $0x168] sm:$0xff]  ;;  %v265_v10 = vld [vmem:[%s1825_s1 + $0x178] sm:$0xff] }
  0xa2   :  { %v1129_v14 = vpack.c.bf16 %v1308_v11, %v1307_v12  ;;  %v1311_v15 = vpop.permute.xlu0 %1310  ;;  %v262_v11 = vld [vmem:[%s1825_s1 + $0x160] sm:$0xff]  ;;  %v264_v12 = vld [vmem:[%s1825_s1 + $0x170] sm:$0xff] }
  0xa3   :  { %v1313_v18 = vunpack.i.h.bf16 %v1311_v15  ;;  %v1312_v19 = vunpack.i.l.bf16 %v1311_v15  ;;  %1088 = vmatprep.subr.msk.bf16.mxu0 %vm1505_vm3, %v1086_v13  ;;  %v1316_v24 = vpop.permute.xlu1 %1315 }
  0xa4   :  { %v1318_v25 = vunpack.i.h.bf16 %v1316_v24  ;;  %v1317_v27 = vunpack.i.l.bf16 %v1316_v24  ;;  %1131 = vmatpush1.bf16.msk.msra.mxu1 %vm1589_vm1, %v1129_v14 }
  0xa5   :  { %v1089_v28 = vpack.c.bf16 %v1313_v18, %v1312_v19  ;;  %1132 = vmatprep.subr.bf16.mxu1 %v1387_v3  ;;  %v225_v3 = vld [vmem:[%s1825_s1 + $0x38] sm:$0xff] }
  0xa6   :  { %v1133_v29 = vpack.c.bf16 %v1318_v25, %v1317_v27 }
  0xa7   :  { %1091 = vmatpush3.bf16.msk.msra.mxu0 %vm1509_vm4, %v1089_v28 }
  0xa8   :  { %1135 = vmatpush1.bf16.msk.msra.mxu1 %vm1589_vm1, %v1133_v29 }
  0xaa   :  { %368 = vmatmul.mubr.f32.vlgmr.msra.gmra.mrb[0].mxu0 %v218_v30 }
  0xab   :  { %493 = vmatmul.mubr.f32.vlgmr.msra.gmra.mrb[0].mxu1 %v220_v31  ;;  %372 = vmatprep.mubr.f32.mxu0 %v223_v32 }
  0xac   :  { %885 = vmatprep.mubr.msk.f32.mxu1 %vm266_vm0, %v225_v3 }
  0xae   :  { %373 = vmatmul.mubr.f32.gmra.mrb[2].mxu0 %v222_v35 }
  0xaf   :  { %498 = vmatmul.mubr.f32.gmra.mrb[2].mxu1 %v224_v34  ;;  %377 = vmatprep.mubr.f32.mxu0 %v227_v36 }
  0xb0   :  { %886 = vmatprep.mubr.msk.f32.mxu1 %vm266_vm0, %v229_v37 }
  0xb2   :  { %378 = vmatmul.mubr.f32.gmra.mrb[4].mxu0 %v226_v38 }
  0xb3   :  { %503 = vmatmul.mubr.f32.gmra.mrb[4].mxu1 %v228_v39  ;;  %382 = vmatprep.mubr.f32.mxu0 %v231_v40 }
  0xb4   :  { %887 = vmatprep.mubr.msk.f32.mxu1 %vm266_vm0, %v233_v41 }
  0xb6   :  { %383 = vmatmul.mubr.f32.gmra.mrb[6].mxu0 %v230_v42 }
  0xb7   :  { %508 = vmatmul.mubr.f32.gmra.mrb[6].mxu1 %v232_v43  ;;  %387 = vmatprep.mubr.f32.mxu0 %v235_v44 }
  0xb8   :  { %888 = vmatprep.mubr.msk.f32.mxu1 %vm266_vm0, %v237_v45 }
  0xba   :  { %388 = vmatmul.mubr.f32.gmra.mrb[8].mxu0 %v234_v46 }
  0xbb   :  { %513 = vmatmul.mubr.f32.gmra.mrb[8].mxu1 %v236_v47  ;;  %392 = vmatprep.mubr.f32.mxu0 %v239_v48 }
  0xbc   :  { %889 = vmatprep.mubr.msk.f32.mxu1 %vm266_vm0, %v241_v49 }
  0xbe   :  { %393 = vmatmul.mubr.f32.gmra.mrb[10].mxu0 %v238_v6 }
  0xbf   :  { %518 = vmatmul.mubr.f32.gmra.mrb[10].mxu1 %v240_v7  ;;  %397 = vmatprep.mubr.f32.mxu0 %v243_v50 }
  0xc0   :  { %890 = vmatprep.mubr.msk.f32.mxu1 %vm266_vm0, %v245_v51 }
  0xc2   :  { %398 = vmatmul.mubr.f32.gmra.mrb[12].mxu0 %v242_v52 }
  0xc3   :  { %523 = vmatmul.mubr.f32.gmra.mrb[12].mxu1 %v244_v53  ;;  %402 = vmatprep.mubr.f32.mxu0 %v247_v55  ;;  %v1321_v53 = vpop.permute.xlu0 %1320 }
  0xc4   :  { %891 = vmatprep.mubr.msk.f32.mxu1 %vm266_vm0, %v249_v56 }
  0xc6   :  { %403 = vmatmul.mubr.f32.gmra.mrb[14].mxu0 %v246_v57 }
  0xc7   :  { %528 = vmatmul.mubr.f32.gmra.mrb[14].mxu1 %v248_v0  ;;  %407 = vmatprep.mubr.f32.mxu0 %v251_v1 }
  0xc8   :  { %892 = vmatprep.mubr.msk.f32.mxu1 %vm266_vm0, %v253_v58 }
  0xca   :  { %408 = vmatmul.mubr.f32.gmra.mrb[16].mxu0 %v250_v59  ;;  %v1323_v59 = vunpack.i.h.bf16 %v1321_v53 }
  0xcb   :  { %533 = vmatmul.mubr.f32.gmra.mrb[16].mxu1 %v252_v60  ;;  %412 = vmatprep.mubr.f32.mxu0 %v255_v61  ;;  %v1322_v60 = vunpack.i.l.bf16 %v1321_v53 }
  0xcc   :  { %893 = vmatprep.mubr.msk.f32.mxu1 %vm266_vm0, %v257_v62 }
  0xce   :  { %413 = vmatmul.mubr.f32.gmra.mrb[18].mxu0 %v254_v63  ;;  %v1326_v63 = vpop.permute.xlu1 %1325 }
  0xcf   :  { %538 = vmatmul.mubr.f32.gmra.mrb[18].mxu1 %v256_v26  ;;  %417 = vmatprep.mubr.f32.mxu0 %v259_v2 }
  0xd0   :  { %894 = vmatprep.mubr.msk.f32.mxu1 %vm266_vm0, %v261_v5 }
  0xd2   :  { %418 = vmatmul.mubr.f32.gmra.mrb[20].mxu0 %v258_v4 }
  0xd3   :  { %543 = vmatmul.mubr.f32.gmra.mrb[20].mxu1 %v260_v8  ;;  %422 = vmatprep.mubr.f32.mxu0 %v263_v9 }
  0xd4   :  { %895 = vmatprep.mubr.msk.f32.mxu1 %vm266_vm0, %v265_v10  ;;  %vm661_vm0 = vcmask 261120  }
  0xd6   :  { %423 = vmatmul.mubr.f32.gmra.mrb[22].mxu0 %v262_v11  ;;  %v1138_v11 = vpack.c.bf16 %v1323_v59, %v1322_v60 }
  0xd7   :  { %548 = vmatmul.mubr.f32.gmra.mrb[22].mxu1 %v264_v12  ;;  %v1328_v12 = vunpack.i.h.bf16 %v1326_v63 }
 0x17d   :  { %v956_v13 = vpop.f32.mrb[0].mxu0 }
 0x17e   :  { %v957_v14 = vpop.f32.mrb[1].mxu0  ;;  %v494_v15 = vpop.f32.mrb[0].mxu1 }
 0x17f   :  { %v958_v18 = vadd.f32 %v957_v14, %v956_v13  ;;  %v496_v19 = vpop.f32.mrb[1].mxu1  ;;  %v1327_v13 = vunpack.i.l.bf16 %v1326_v63 }
 0x181   :  { %v495_v24 = vadd.f32 %v958_v18, %v494_v15  ;;  %v959_v25 = vpop.f32.mrb[2].mxu0 }
 0x182   :  { %v960_v27 = vpop.f32.mrb[3].mxu0  ;;  %v499_v28 = vpop.f32.mrb[2].mxu1 }
 0x183   :  { %v961_v29 = vadd.f32 %v960_v27, %v959_v25  ;;  %v501_v30 = vpop.f32.mrb[3].mxu1 }
 0x185   :  { %v500_v31 = vadd.f32 %v961_v29, %v499_v28  ;;  %v962_v32 = vpop.f32.mrb[4].mxu0 }
 0x186   :  { %v963_v3 = vpop.f32.mrb[5].mxu0  ;;  %v504_v35 = vpop.f32.mrb[4].mxu1 }
 0x187   :  { %v964_v34 = vadd.f32 %v963_v3, %v962_v32  ;;  %v506_v36 = vpop.f32.mrb[5].mxu1  ;;  %v1143_v32 = vpack.c.bf16 %v1328_v12, %v1327_v13 }
 0x189   :  { %v505_v37 = vadd.f32 %v964_v34, %v504_v35  ;;  %v965_v38 = vpop.f32.mrb[6].mxu0 }
 0x18a   :  { %v966_v39 = vpop.f32.mrb[7].mxu0  ;;  %v509_v40 = vpop.f32.mrb[6].mxu1 }
 0x18b   :  { %v563_v41 = vmax.f32 %v495_v24, %v505_v37  ;;  %v567_v42 = vadd.f32 %v505_v37, %v495_v24  ;;  %v967_v43 = vadd.f32 %v966_v39, %v965_v38  ;;  %v511_v44 = vpop.f32.mrb[7].mxu1 }
 0x18d   :  { %v510_v45 = vadd.f32 %v967_v43, %v509_v40  ;;  %v968_v46 = vpop.f32.mrb[8].mxu0 }
 0x18e   :  { %v969_v47 = vpop.f32.mrb[9].mxu0  ;;  %v514_v48 = vpop.f32.mrb[8].mxu1 }
 0x18f   :  { %v564_v49 = vmax.f32 %v500_v31, %v510_v45  ;;  %v568_v6 = vadd.f32 %v510_v45, %v500_v31  ;;  %v970_v7 = vadd.f32 %v969_v47, %v968_v46  ;;  %v516_v50 = vpop.f32.mrb[9].mxu1 }
 0x191   :  { %v515_v51 = vadd.f32 %v970_v7, %v514_v48  ;;  %v971_v52 = vpop.f32.mrb[10].mxu0 }
 0x192   :  { %v972_v55 = vpop.f32.mrb[11].mxu0  ;;  %v519_v56 = vpop.f32.mrb[10].mxu1 }
 0x193   :  { %v565_v57 = vmax.f32 %v563_v41, %v515_v51  ;;  %v569_v0 = vadd.f32 %v567_v42, %v515_v51  ;;  %v973_v1 = vadd.f32 %v972_v55, %v971_v52  ;;  %v521_v58 = vpop.f32.mrb[11].mxu1 }
 0x195   :  { %v520_v61 = vadd.f32 %v973_v1, %v519_v56  ;;  %v974_v62 = vpop.f32.mrb[12].mxu0  ;;  %v571_v10 = vmul.f32 0.33333334, %v569_v0 }
 0x196   :  { %v975_v26 = vpop.f32.mrb[13].mxu0  ;;  %v524_v2 = vpop.f32.mrb[12].mxu1 }
 0x197   :  { %v566_v5 = vmax.f32 %v564_v49, %v520_v61  ;;  %v570_v4 = vadd.f32 %v568_v6, %v520_v61  ;;  %v976_v8 = vadd.f32 %v975_v26, %v974_v62  ;;  %v526_v9 = vpop.f32.mrb[13].mxu1 }
 0x199   :  { %v572_v14 = vmul.f32 0.33333334, %v570_v4  ;;  %v525_v15 = vadd.f32 %v976_v8, %v524_v2  ;;  %v977_v18 = vpop.f32.mrb[14].mxu0  ;;  %v1329_v19 = vpack.i.bf16 %v566_v5, %v565_v57  ;;  %v1136_v24 = vpack.c.bf16 %v566_v5, %v565_v57  ;;  %v656_v4 = vld [vmem:[%s1826_s2 + $0x8] sm:$0xff] }
 0x19a   :  { %v978_v25 = vpop.f32.mrb[15].mxu0  ;;  %v529_v27 = vpop.f32.mrb[14].mxu1  ;;  %732 = vmatprep.mubr.f32.mxu0 %v656_v4 }
 0x19b   :  { %v979_v28 = vadd.f32 %v978_v25, %v977_v18  ;;  %1330 = vrot.lane.b32.xlu0 %v1329_v19, %s1392_s0  ;;  %1137 = vmatprep.subr.bf16.mxu0 %v1136_v24  ;;  %v531_v29 = vpop.f32.mrb[15].mxu1  ;;  %v1344_v30 = vpack.i.bf16 %v572_v14, %v571_v10  ;;  %v1141_v31 = vpack.c.bf16 %v572_v14, %v571_v10 }
 0x19c   :  { %1140 = vmatpush3.bf16.msk.msra.mxu0 %vm1532_vm10, %v1138_v11 }
 0x19d   :  { %v530_v3 = vadd.f32 %v979_v28, %v529_v27  ;;  %v980_v35 = vpop.f32.mrb[16].mxu0  ;;  %1345 = vrot.lane.b32.xlu1 %v1344_v30, %s1392_s0  ;;  %1142 = vmatprep.subr.bf16.mxu0 %v1141_v31 }
 0x19e   :  { %v981_v34 = vpop.f32.mrb[17].mxu0  ;;  %v534_v36 = vpop.f32.mrb[16].mxu1 }
 0x19f   :  { %v982_v37 = vadd.f32 %v981_v34, %v980_v35  ;;  %1335 = vrot.lane.b32.xlu0 %v1487_v20, %s1388_s24  ;;  %v536_v38 = vpop.f32.mrb[17].mxu1 }
 0x1a0   :  { %1145 = vmatpush3.bf16.msk.msra.mxu0 %vm1532_vm10, %v1143_v32 }
 0x1a1   :  { %v535_v39 = vadd.f32 %v982_v37, %v534_v36  ;;  %v983_v40 = vpop.f32.mrb[18].mxu0 }
 0x1a2   :  { %v984_v41 = vpop.f32.mrb[19].mxu0  ;;  %v539_v42 = vpop.f32.mrb[18].mxu1 }
 0x1a3   :  { %v573_v43 = vmax.f32 %v525_v15, %v535_v39  ;;  %v577_v44 = vadd.f32 %v535_v39, %v525_v15  ;;  %v985_v45 = vadd.f32 %v984_v41, %v983_v40  ;;  %1340 = vrot.lane.b32.xlu0 %v1497_v23, %s1388_s24  ;;  %v541_v46 = vpop.f32.mrb[19].mxu1 }
 0x1a5   :  { %v540_v47 = vadd.f32 %v985_v45, %v539_v42  ;;  %v986_v48 = vpop.f32.mrb[20].mxu0 }
 0x1a6   :  { %v987_v49 = vpop.f32.mrb[21].mxu0  ;;  %v544_v6 = vpop.f32.mrb[20].mxu1 }
 0x1a7   :  { %v574_v20 = vmax.f32 %v530_v3, %v540_v47  ;;  %v578_v7 = vadd.f32 %v540_v47, %v530_v3  ;;  %v988_v50 = vadd.f32 %v987_v49, %v986_v48  ;;  %1360 = vrot.lane.b32.xlu0 %v1329_v19, %s1388_s24  ;;  %v546_v51 = vpop.f32.mrb[21].mxu1  ;;  %v1171_v47 = vpack.c.bf16 %v1481_v17, %v1478_v16  ;;  %v655_v16 = vld [vmem:[%s1826_s2] sm:$0xff] }
 0x1a8   :  { %v659_v17 = vld [vmem:[%s1826_s2 + $0x20] sm:$0xff] }
 0x1a9   :  { %v545_v52 = vadd.f32 %v988_v50, %v544_v6  ;;  %v989_v53 = vpop.f32.mrb[22].mxu0 }
 0x1aa   :  { %v990_v55 = vpop.f32.mrb[23].mxu0  ;;  %v549_v56 = vpop.f32.mrb[22].mxu1 }
 0x1ab   :  { %v575_v57 = vmax.f32 %v573_v43, %v545_v52  ;;  %v579_v0 = vadd.f32 %v577_v44, %v545_v52  ;;  %v991_v1 = vadd.f32 %v990_v55, %v989_v53  ;;  %v551_v58 = vpop.f32.mrb[23].mxu1  ;;  %v660_v53 = vld [vmem:[%s1826_s2 + $0x28] sm:$0xff] }
 0x1ad   :  { %v550_v23 = vadd.f32 %v991_v1, %v549_v56  ;;  %v581_v61 = vmul.f32 0.33333334, %v579_v0 }
 0x1af   :  { %v576_v59 = vmax.f32 %v574_v20, %v550_v23  ;;  %v580_v60 = vadd.f32 %v578_v7, %v550_v23  ;;  %v1176_v7 = vpack.c.bf16 %v1491_v22, %v1489_v21  ;;  %v658_v21 = vld [vmem:[%s1826_s2 + $0x18] sm:$0xff]  ;;  %v657_v22 = vld [vmem:[%s1826_s2 + $0x10] sm:$0xff] }
 0x1b1   :  { %v582_v62 = vmul.f32 0.33333334, %v580_v60  ;;  %v1349_v63 = vpack.i.bf16 %v576_v59, %v575_v57  ;;  %v1146_v26 = vpack.c.bf16 %v576_v59, %v575_v57 }
 0x1b3   :  { %1350 = vrot.lane.b32.xlu1 %v1349_v63, %s1392_s0  ;;  %1370 = vrot.lane.b32.xlu0 %v1349_v63, %s1388_s24  ;;  %v1354_v2 = vpack.i.bf16 %v582_v62, %v581_v61  ;;  %v1151_v5 = vpack.c.bf16 %v582_v62, %v581_v61 }
 0x1b4   :  { %1147 = vmatprep.subr.bf16.mxu0 %v1146_v26 }
 0x1b7   :  { %1355 = vrot.lane.b32.xlu1 %v1354_v2, %s1392_s0 }
 0x1bb   :  { %1365 = vrot.lane.b32.xlu1 %v1344_v30, %s1388_s24 }
 0x1bf   :  { %1375 = vrot.lane.b32.xlu1 %v1354_v2, %s1388_s24 }
 0x20d   :  { %v1331_v8 = vpop.permute.xlu0 %1330 }
 0x20e   :  { %v1333_v9 = vunpack.i.h.bf16 %v1331_v8  ;;  %v1332_v10 = vunpack.i.l.bf16 %v1331_v8 }
 0x20f   :  { %v1346_v11 = vpop.permute.xlu1 %1345 }
 0x210   :  { %v1148_v12 = vpack.c.bf16 %v1333_v9, %v1332_v10  ;;  %v1348_v13 = vunpack.i.h.bf16 %v1346_v11  ;;  %v1347_v14 = vunpack.i.l.bf16 %v1346_v11 }
 0x211   :  { %v1336_v15 = vpop.permute.xlu0 %1335 }
 0x212   :  { %v1338_v18 = vunpack.i.h.bf16 %v1336_v15  ;;  %v1337_v19 = vunpack.i.l.bf16 %v1336_v15  ;;  %1150 = vmatpush3.bf16.msk.msra.mxu0 %vm1532_vm10, %v1148_v12  ;;  %v1153_v24 = vpack.c.bf16 %v1348_v13, %v1347_v14 }
 0x213   :  { %1152 = vmatprep.subr.bf16.mxu0 %v1151_v5 }
 0x214   :  { %v1156_v25 = vpack.c.bf16 %v1338_v18, %v1337_v19 }
 0x215   :  { %v1341_v27 = vpop.permute.xlu0 %1340 }
 0x216   :  { %1155 = vmatpush3.bf16.msk.msra.mxu0 %vm1532_vm10, %v1153_v24  ;;  %v1343_v28 = vunpack.i.h.bf16 %v1341_v27  ;;  %v1342_v29 = vunpack.i.l.bf16 %v1341_v27 }
 0x217   :  { %1158 = vmatprep.subr.msk.bf16.mxu0 %vm1505_vm3, %v1156_v25 }
 0x218   :  { %v1162_v35 = vpack.c.bf16 %v1343_v28, %v1342_v29 }
 0x219   :  { %v1361_v31 = vpop.permute.xlu0 %1360 }
 0x21a   :  { %v1363_v36 = vunpack.i.h.bf16 %v1361_v31  ;;  %v1362_v37 = vunpack.i.l.bf16 %v1361_v31 }
 0x21c   :  { %v1168_v42 = vpack.c.bf16 %v1363_v36, %v1362_v37 }
 0x225   :  { %v1351_v30 = vpop.permute.xlu1 %1350  ;;  %v1371_v44 = vpop.permute.xlu0 %1370 }
 0x226   :  { %v1353_v32 = vunpack.i.h.bf16 %v1351_v30  ;;  %v1352_v3 = vunpack.i.l.bf16 %v1351_v30  ;;  %v1373_v49 = vunpack.i.h.bf16 %v1371_v44  ;;  %v1372_v6 = vunpack.i.l.bf16 %v1371_v44 }
 0x228   :  { %v1159_v34 = vpack.c.bf16 %v1353_v32, %v1352_v3  ;;  %v1178_v50 = vpack.c.bf16 %v1373_v49, %v1372_v6 }
 0x229   :  { %v1356_v38 = vpop.permute.xlu1 %1355 }
 0x22a   :  { %v1358_v39 = vunpack.i.h.bf16 %v1356_v38  ;;  %v1357_v40 = vunpack.i.l.bf16 %v1356_v38  ;;  %1161 = vmatpush3.bf16.msk.msra.mxu0 %vm1532_vm10, %v1159_v34 }
 0x22b   :  { %1164 = vmatprep.subr.msk.bf16.mxu0 %vm1505_vm3, %v1162_v35 }
 0x22c   :  { %v1165_v41 = vpack.c.bf16 %v1358_v39, %v1357_v40 }
 0x22d   :  { %v1366_v43 = vpop.permute.xlu1 %1365 }
 0x22e   :  { %v1368_v45 = vunpack.i.h.bf16 %v1366_v43  ;;  %v1367_v46 = vunpack.i.l.bf16 %v1366_v43  ;;  %1167 = vmatpush3.bf16.msk.msra.mxu0 %vm1532_vm10, %v1165_v41 }
 0x22f   :  { %1170 = vmatprep.subr.msk.bf16.mxu0 %vm1505_vm3, %v1168_v42 }
 0x230   :  { %v1173_v48 = vpack.c.bf16 %v1368_v45, %v1367_v46 }
 0x231   :  { %v1376_v20 = vpop.permute.xlu1 %1375 }
 0x232   :  { %1172 = vmatpush3.bf16.msra.mxu0 %v1171_v47  ;;  %v1378_v54 = vunpack.i.h.bf16 %v1376_v20  ;;  %v1377_v51 = vunpack.i.l.bf16 %v1376_v20 }
 0x233   :  { %1175 = vmatprep.subr.msk.bf16.mxu0 %vm1505_vm3, %v1173_v48 }
 0x234   :  { %v1184_v52 = vpack.c.bf16 %v1378_v54, %v1377_v51 }
 0x236   :  { %1177 = vmatpush3.bf16.msra.mxu0 %v1176_v7 }
 0x237   :  { %1180 = vmatprep.subr.msk.bf16.mxu0 %vm1505_vm3, %v1178_v50 }
 0x239   :  { %733 = vmatmul.mubr.f32.vlgmr.msra.gmra.mrb[24].mxu0 %v655_v16 }
 0x23a   :  { %1183 = vmatpush3.bf16.msk.msra.mxu0 %vm1505_vm3, %v1178_v50  ;;  %737 = vmatprep.mubr.f32.mxu0 %v659_v17 }
 0x23b   :  { %1186 = vmatprep.subr.msk.bf16.mxu0 %vm1505_vm3, %v1184_v52 }
 0x23d   :  { %738 = vmatmul.mubr.f32.gmra.mrb[26].mxu0 %v658_v21 }
 0x23e   :  { %1189 = vmatpush3.bf16.msk.msra.mxu0 %vm1505_vm3, %v1184_v52  ;;  %1044 = vmatprep.mubr.msk.f32.mxu0 %vm661_vm0, %v657_v22 }
 0x241   :  { %1045 = vmatmul.mubr.msk.f32.vlgmr.msra.gmra.mrb[28].mxu0 %vm661_vm0, %v660_v53 }
 0x30c   :  { %v1024_v55 = vpop.f32.mrb[24].mxu0 }
 0x30d   :  { %v1025_v56 = vpop.f32.mrb[25].mxu0 }
 0x30e   :  { %v1026_v57 = vadd.f32 %v1025_v56, %v1024_v55 }
 0x310   :  { %v1027_v0 = vpop.f32.mrb[26].mxu0 }
 0x311   :  { %v1028_v1 = vpop.f32.mrb[27].mxu0 }
 0x312   :  { %v1029_v58 = vadd.f32 %v1028_v1, %v1027_v0 }
 0x314   :  { %v1046_v23 = vpop.f32.mrb[28].mxu0 }
 0x315   :  { %v815_v59 = vadd.f32 %v1046_v23, %v1029_v58  ;;  %v809_v60 = vpop.f32.mrb[29].mxu0 }
 0x316   :  { %v810_v61 = vadd.f32 %v1026_v57, %v809_v60 }
 0x317   :  { %v923_v62 = vmul.f32 -1.442695, %v815_v59 }
 0x318   :  { %v922_v63 = vmul.f32 -1.442695, %v810_v61 }
 0x319   :  { %1379 = vpow2.f32 %v923_v62 }
 0x31a   :  { %1381 = vpow2.f32 %v922_v63 }
 0x323   :  { %v1380_v33 = vpop.eup %1379 }
 0x324   :  { %v1382_v26 = vpop.eup %1381  ;;  %v825_v2 = vadd.f32 1.0, %v1380_v33 }
 0x325   :  { %v824_v5 = vadd.f32 1.0, %v1382_v26 }
 0x326   :  { %1383 = vrcp.f32 %v825_v2 }
 0x327   :  { %1385 = vrcp.f32 %v824_v5 }
 0x330   :  { %v1384_v4 = vpop.eup %1383 }
 0x331   :  { %v1386_v8 = vpop.eup %1385  ;;  %831 = vst [vmem:[%s1827_s3 + $0x8] sm:$0xff] %v1384_v4 }
 0x332   :  { %830 = vst [vmem:[%s1827_s3] sm:$0xff] %v1386_v8 }

</bundles_post_ra>
